<compile_context>
chip_gen: v7x
topology: tpu7x:2x2x1
jax: 0.10.0
libtpu: 0.0.40
codegen_flags: <defaults>
</compile_context>

<pallas_src>
import functools

import jax
import jax.numpy as jnp
from jax.experimental import pallas as pl
from jax.experimental.pallas import tpu as pltpu

_VMEM_LIMIT = 48 * 1024 * 1024   # safe on v5e/v6e (128 MiB) and v7x (64 MiB per TC)


# ---------------------------------------------------------------------------
# In-kernel helpers (traced inside the Pallas kernels)
# ---------------------------------------------------------------------------
def _layernorm(x, scale, shift, eps=1e-5):
    # Matches torch: mean over last dim, biased variance (unbiased=False).
    mean = jnp.mean(x, axis=-1, keepdims=True)
    var = jnp.mean((x - mean) ** 2, axis=-1, keepdims=True)
    return (x - mean) * jax.lax.rsqrt(var + eps) * scale + shift


def _gelu(x):
    # Tanh-approximate GELU exactly as in the reference GELU module.
    return 0.5 * x * (1.0 + jnp.tanh((2.0 / jnp.pi) ** 0.5 * (x + 0.044715 * x ** 3)))


def _pick_tile(s, candidates):
    for c in candidates:
        if s % c == 0:
            return c
    return s


def _round_up(x, m):
    return (x + m - 1) // m * m


# ---------------------------------------------------------------------------
# Kernel 1: LayerNorm1 + fused QKV projection  (grid = (S//TQ, B))
# ---------------------------------------------------------------------------
def ln_qkv_kernel(x_ref, g_ref, b_ref, wqkv_ref, q_ref, k_ref, v_ref,
                  *, emb_dim, inv_sqrt_dh):
    x = x_ref[0]                                                   # (TQ, D) f32
    xn = _layernorm(x, g_ref[...], b_ref[...]).astype(jnp.bfloat16)
    qkv = jnp.dot(xn, wqkv_ref[...], preferred_element_type=jnp.float32)  # (TQ, 3D)
    D = emb_dim
    q_ref[0] = (qkv[:, :D] * inv_sqrt_dh).astype(q_ref.dtype)  # fold softmax scale
    k_ref[0] = qkv[:, D:2 * D].astype(k_ref.dtype)
    v_ref[0] = qkv[:, 2 * D:].astype(v_ref.dtype)


def ln_qkv(x, ln_s, ln_b, wqkv, num_heads, tq):
    B, S, D = x.shape
    d_head = D // num_heads
    kernel = functools.partial(ln_qkv_kernel, emb_dim=D,
                               inv_sqrt_dh=1.0 / (d_head ** 0.5))
    full = lambda shape: pl.BlockSpec(shape, lambda i, b: (0, 0))
    spec_bsd = pl.BlockSpec((1, tq, D), lambda i, b: (b, i, 0))
    out = jax.ShapeDtypeStruct((B, S, D), jnp.bfloat16)
    return pl.pallas_call(
        kernel,
        out_shape=(out, out, out),
        grid=(S // tq, B),
        in_specs=[spec_bsd, full((1, D)), full((1, D)), full((D, 3 * D))],
        out_specs=(spec_bsd, spec_bsd, spec_bsd),
        compiler_params=pltpu.CompilerParams(
            dimension_semantics=("parallel", "parallel"),
            vmem_limit_bytes=_VMEM_LIMIT),
    )(x, ln_s, ln_b, wqkv)


# ---------------------------------------------------------------------------
# Kernel 2: causal flash attention, heads-in-kernel
#           grid = (B, S//T, S//T), online softmax over KV tiles
# ---------------------------------------------------------------------------
def flash_attn_kernel(q_ref, k_ref, v_ref, o_ref, m_sc, l_sc, acc_sc,
                      *, num_heads, d_head):
    qi = pl.program_id(1)
    ki = pl.program_id(2)
    nk = pl.num_programs(2)

    @pl.when(ki == 0)
    def _():
        m_sc[...] = jnp.full(m_sc.shape, -jnp.inf, m_sc.dtype)
        l_sc[...] = jnp.zeros(l_sc.shape, l_sc.dtype)
        acc_sc[...] = jnp.zeros(acc_sc.shape, acc_sc.dtype)

    def update(masked):
        q_full = q_ref[0]      # (TQ, D) bf16, pre-scaled by 1/sqrt(d_head)
        k_full = k_ref[0]      # (TK, D) bf16
        v_full = v_ref[0]      # (TK, D) bf16
        if masked:
            tq_, tk_ = q_full.shape[0], k_full.shape[0]
            rows = jax.lax.broadcasted_iota(jnp.int32, (tq_, tk_), 0)
            cols = jax.lax.broadcasted_iota(jnp.int32, (tq_, tk_), 1)
            causal = cols > rows            # tq == tk and qi == ki on this path
        for h in range(num_heads):
            lo = h * d_head
            q = q_full[:, lo:lo + d_head]
            k = k_full[:, lo:lo + d_head]
            v = v_full[:, lo:lo + d_head]
            s = jax.lax.dot_general(q, k, (((1,), (1,)), ((), ())),
                                    preferred_element_type=jnp.float32)  # (TQ, TK)
            if masked:
                s = jnp.where(causal, -jnp.inf, s)
            m_prev = m_sc[h]
            m_new = jnp.maximum(m_prev, jnp.max(s, axis=-1, keepdims=True))
            alpha = jnp.exp(m_prev - m_new)
            p = jnp.exp(s - m_new)
            l_sc[h] = alpha * l_sc[h] + jnp.sum(p, axis=-1, keepdims=True)
            acc_sc[h] = alpha * acc_sc[h] + jnp.dot(
                p.astype(v.dtype), v, preferred_element_type=jnp.float32)
            m_sc[h] = m_new

    # Strictly-past KV tiles: no mask work at all.
    @pl.when(ki < qi)
    def _():
        update(masked=False)

    # Diagonal tile (tq == tk): triangular mask, matches triu(ones, diagonal=1).
    @pl.when(ki == qi)
    def _():
        update(masked=True)

    # ki > qi tiles are entirely in the causal future: compute is skipped and the
    # K/V index_map is clamped, so no HBM traffic is issued for them either.

    @pl.when(ki == nk - 1)
    def _():
        for h in range(num_heads):
            inv_l = pl.reciprocal(l_sc[h], approx=True)
            o_ref[0, :, h * d_head:(h + 1) * d_head] = (
                acc_sc[h] * inv_l).astype(o_ref.dtype)


def flash_attention(q, k, v, num_heads, t_att):
    B, S, D = q.shape
    d_head = D // num_heads
    nq = S // t_att
    kernel = functools.partial(flash_attn_kernel,
                               num_heads=num_heads, d_head=d_head)
    q_spec = pl.BlockSpec((1, t_att, D), lambda b, qi, ki: (b, qi, 0))
    # Clamp the KV block index so causally-dead tiles re-use the resident block
    # (no DMA) instead of streaming unused K/V from HBM.
    kv_spec = pl.BlockSpec((1, t_att, D),
                           lambda b, qi, ki: (b, jnp.minimum(ki, qi), 0))
    return pl.pallas_call(
        kernel,
        out_shape=jax.ShapeDtypeStruct((B, S, D), jnp.bfloat16),
        grid=(B, nq, nq),
        in_specs=[q_spec, kv_spec, kv_spec],
        out_specs=q_spec,
        scratch_shapes=[pltpu.VMEM((num_heads, t_att, 1), jnp.float32),
                        pltpu.VMEM((num_heads, t_att, 1), jnp.float32),
                        pltpu.VMEM((num_heads, t_att, d_head), jnp.float32)],
        compiler_params=pltpu.CompilerParams(
            dimension_semantics=("parallel", "parallel", "arbitrary"),
            vmem_limit_bytes=_VMEM_LIMIT),
    )(q, k, v)


# ---------------------------------------------------------------------------
# Kernel 3: attention out-proj + residual + LayerNorm2 + FFN(GELU) + residual
#           (optionally fuses the final model LayerNorm -> bf16 output)
# ---------------------------------------------------------------------------
def attn_out_ffn_kernel(x_ref, ctx_ref, wo_ref, bo_ref, g2_ref, beta2_ref,
                        w1_ref, b1_ref, w2_ref, b2_ref, *rest, final_ln):
    if final_ln:
        gf_ref, betaf_ref, o_ref = rest
    else:
        (o_ref,) = rest
    x = x_ref[0]                               # (TQ, D) f32 residual stream
    ctx = ctx_ref[0]                           # (TQ, D) bf16 attention context
    attn = jnp.dot(ctx, wo_ref[...], preferred_element_type=jnp.float32) + bo_ref[...]
    x = x + attn                               # residual (dropout == identity)
    xn = _layernorm(x, g2_ref[...], beta2_ref[...]).astype(jnp.bfloat16)
    h = jnp.dot(xn, w1_ref[...], preferred_element_type=jnp.float32) + b1_ref[...]
    h = _gelu(h).astype(jnp.bfloat16)          # GELU stats in f32, cast for MXU
    y = jnp.dot(h, w2_ref[...], preferred_element_type=jnp.float32) + b2_ref[...]
    out = x + y                                # residual (dropout == identity)
    if final_ln:
        # Fused final LayerNorm: computed once per token (not per vocab tile).
        o_ref[0] = _layernorm(out, gf_ref[...], betaf_ref[...]).astype(o_ref.dtype)
    else:
        o_ref[0] = out.astype(o_ref.dtype)


def attn_out_ffn(x, ctx, p, tq, final_ln=None):
    B, S, D = x.shape
    Hff = p["w1"].shape[1]
    full = lambda shape: pl.BlockSpec(shape, lambda i, b: (0, 0))
    spec_bsd = pl.BlockSpec((1, tq, D), lambda i, b: (b, i, 0))
    in_specs = [spec_bsd, spec_bsd,
                full((D, D)), full((1, D)),
                full((1, D)), full((1, D)),
                full((D, Hff)), full((1, Hff)),
                full((Hff, D)), full((1, D))]
    args = [x, ctx, p["wo"], p["bo"], p["ln2_s"], p["ln2_b"],
            p["w1"], p["b1"], p["w2"], p["b2"]]
    if final_ln is not None:
        in_specs += [full((1, D)), full((1, D))]
        args += [final_ln[0], final_ln[1]]
        out_dtype = jnp.bfloat16          # feeds the LM head matmul directly
    else:
        out_dtype = jnp.float32           # residual stream stays f32 between blocks
    kernel = functools.partial(attn_out_ffn_kernel, final_ln=final_ln is not None)
    return pl.pallas_call(
        kernel,
        out_shape=jax.ShapeDtypeStruct((B, S, D), out_dtype),
        grid=(S // tq, B),
        in_specs=in_specs,
        out_specs=spec_bsd,
        compiler_params=pltpu.CompilerParams(
            dimension_semantics=("parallel", "parallel"),
            vmem_limit_bytes=_VMEM_LIMIT),
    )(*args)


# ---------------------------------------------------------------------------
# Kernel 4: LM head (pure matmul, vocab axis OUTERMOST so each weight slab
#           streams through VMEM once), bf16 logits
# ---------------------------------------------------------------------------
def lm_head_kernel(xn_ref, w_ref, o_ref):
    o_ref[0] = jnp.dot(xn_ref[0], w_ref[...],
                       preferred_element_type=jnp.float32).astype(o_ref.dtype)


def lm_head(xn, w_out, tq, tv):
    B, S, D = xn.shape
    Vp = w_out.shape[1]
    return pl.pallas_call(
        lm_head_kernel,
        out_shape=jax.ShapeDtypeStruct((B, S, Vp), jnp.bfloat16),
        grid=(Vp // tv, B, S // tq),
        in_specs=[pl.BlockSpec((1, tq, D), lambda j, b, i: (b, i, 0)),
                  pl.BlockSpec((D, tv), lambda j, b, i: (0, j))],
        out_specs=pl.BlockSpec((1, tq, tv), lambda j, b, i: (b, i, j)),
        compiler_params=pltpu.CompilerParams(
            dimension_semantics=("parallel", "parallel", "parallel"),
            vmem_limit_bytes=_VMEM_LIMIT),
    )(xn, w_out)


# ---------------------------------------------------------------------------
# One TransformerDecoderOnly block (no XLA-side transposes; heads live in-kernel)
# ---------------------------------------------------------------------------
def decoder_block(x, p, num_heads, t_tok, t_att, final_ln=None):
    q, k, v = ln_qkv(x, p["ln1_s"], p["ln1_b"], p["wqkv"], num_heads, t_tok)
    ctx = flash_attention(q, k, v, num_heads, t_att)
    return attn_out_ffn(x, ctx, p, t_tok, final_ln=final_ln)


# ---------------------------------------------------------------------------
# Parameter init (deterministic, synthetic) and forward wrapper
# ---------------------------------------------------------------------------
def init_params(key, vocab_size, ctx_len, emb_dim, n_heads, n_layers):
    del n_heads  # head split does not change parameter shapes
    keys = jax.random.split(key, 3 + n_layers)

    def nrm(k, shape, scale=0.02, dtype=jnp.float32):
        return (scale * jax.random.normal(k, shape)).astype(dtype)

    D, Hff = emb_dim, 4 * emb_dim
    params = {
        "tok_emb": nrm(keys[0], (vocab_size, D), 1.0),
        "pos_emb": nrm(keys[1], (ctx_len, D), 1.0),
        "ln_f_s": jnp.ones((1, D), jnp.float32),
        "ln_f_b": jnp.zeros((1, D), jnp.float32),
        # (in, out) layout, no bias; bf16 so the MXU runs at full rate.
        "w_out": nrm(keys[2], (D, vocab_size), dtype=jnp.bfloat16),
        "layers": [],
    }
    for i in range(n_layers):
        lk = jax.random.split(keys[3 + i], 4)
        params["layers"].append({
            "ln1_s": jnp.ones((1, D), jnp.float32),
            "ln1_b": jnp.zeros((1, D), jnp.float32),
            # Fused Q/K/V projection: columns [0:D]=wq, [D:2D]=wk, [2D:3D]=wv.
            "wqkv": nrm(lk[0], (D, 3 * D), dtype=jnp.bfloat16),
            "wo": nrm(lk[1], (D, D), dtype=jnp.bfloat16),
            "bo": jnp.zeros((1, D), jnp.float32),
            "ln2_s": jnp.ones((1, D), jnp.float32),
            "ln2_b": jnp.zeros((1, D), jnp.float32),
            "w1": nrm(lk[2], (D, Hff), dtype=jnp.bfloat16),
            "b1": jnp.zeros((1, Hff), jnp.float32),
            "w2": nrm(lk[3], (Hff, D), dtype=jnp.bfloat16),
            "b2": jnp.zeros((1, D), jnp.float32),
        })
    return params


def gpt2_small_forward(params, input_indices, n_heads):
    B, S = input_indices.shape
    # 256-wide tiles fill the v6e/v7x MXU; fall back to the full extent at tiny S.
    t_tok = _pick_tile(S, (256, 128))
    t_att = _pick_tile(S, (256, 128))   # attention requires tq == tk (NaN safety)

    # Embedding gathers + positional add: plain-JAX glue.
    tok = params["tok_emb"][input_indices]            # (B, S, D)
    pos = params["pos_emb"][:S]                       # (S, D)
    x = (tok + pos).astype(jnp.float32)

    layers = params["layers"]
    n_layers = len(layers)
    for li, lp in enumerate(layers):
        fin = (params["ln_f_s"], params["ln_f_b"]) if li == n_layers - 1 else None
        x = decoder_block(x, lp, n_heads, t_tok, t_att, final_ln=fin)
    # x is now the bf16 final-LayerNorm'd activation (fused into the last block).

    # LM head: pad the vocab axis to a multiple of the (128-aligned) vocab tile.
    w_out = params["w_out"]
    V = w_out.shape[1]
    tv = min(2048, _round_up(V, 128))
    Vp = _round_up(V, tv)
    if Vp != V:
        w_out = jnp.pad(w_out, ((0, 0), (0, Vp - V)))
    logits = lm_head(x, w_out, t_tok, tv)             # bf16 logits
    return logits[:, :, :V]


# ---------------------------------------------------------------------------
if __name__ == "__main__":
    vocab_size, ctx_len, emb_dim, n_heads, n_layers = 256, 16, 32, 4, 2
    B, S = 2, 8

    key = jax.random.PRNGKey(0)
    pkey, ikey = jax.random.split(key)
    params = init_params(pkey, vocab_size, ctx_len, emb_dim, n_heads, n_layers)
    input_indices = jax.random.randint(ikey, (B, S), 0, vocab_size, dtype=jnp.int32)

    logits = gpt2_small_forward(params, input_indices, n_heads)
    logits = jax.block_until_ready(logits)
    assert logits.shape == (B, S, vocab_size), logits.shape
    assert bool(jnp.all(jnp.isfinite(logits.astype(jnp.float32))))
    print("KERNEL_OK")
</pallas_src>

<mosaic_0001>
module attributes {stable_mosaic.version = 11 : i64} {
  func.func @ln_qkv_kernel(%arg0: i32, %arg1: i32, %arg2: memref<1x8x32xf32, #tpu.memory_space<vmem>>, %arg3: memref<1x32xf32, #tpu.memory_space<vmem>>, %arg4: memref<1x32xf32, #tpu.memory_space<vmem>>, %arg5: memref<32x96xbf16, #tpu.memory_space<vmem>>, %arg6: memref<1x8x32xbf16, #tpu.memory_space<vmem>>, %arg7: memref<1x8x32xbf16, #tpu.memory_space<vmem>>, %arg8: memref<1x8x32xbf16, #tpu.memory_space<vmem>>) attributes {dimension_semantics = [#tpu.dimension_semantics<parallel>, #tpu.dimension_semantics<parallel>], iteration_bounds = array<i64: 1, 2>, scalar_prefetch = 0 : i64, scratch_operands = 0 : i64, tpu.core_type = #tpu.core_type<tc>, window_params = [{transform_indices = @transform_0, window_bounds = array<i64: 1, 8, 32>}, {pipeline_mode = #tpu.pipeline_mode<synchronous>, transform_indices = @transform_1, window_bounds = array<i64: 1, 32>}, {pipeline_mode = #tpu.pipeline_mode<synchronous>, transform_indices = @transform_2, window_bounds = array<i64: 1, 32>}, {pipeline_mode = #tpu.pipeline_mode<synchronous>, transform_indices = @transform_3, window_bounds = array<i64: 32, 96>}, {transform_indices = @transform_4, window_bounds = array<i64: 1, 8, 32>}, {transform_indices = @transform_5, window_bounds = array<i64: 1, 8, 32>}, {transform_indices = @transform_6, window_bounds = array<i64: 1, 8, 32>}]} {
    %c0 = arith.constant 0 : index
    %c0_0 = arith.constant 0 : index
    %c0_1 = arith.constant 0 : index
    %0 = vector.load %arg2[%c0, %c0_0, %c0_1] : memref<1x8x32xf32, #tpu.memory_space<vmem>>, vector<1x8x32xf32>
    %1 = vector.shape_cast %0 : vector<1x8x32xf32> to vector<8x32xf32>
    %c0_2 = arith.constant 0 : index
    %c0_3 = arith.constant 0 : index
    %2 = vector.load %arg3[%c0_2, %c0_3] : memref<1x32xf32, #tpu.memory_space<vmem>>, vector<1x32xf32>
    %c0_4 = arith.constant 0 : index
    %c0_5 = arith.constant 0 : index
    %3 = vector.load %arg4[%c0_4, %c0_5] : memref<1x32xf32, #tpu.memory_space<vmem>>, vector<1x32xf32>
    %cst = arith.constant dense<0.000000e+00> : vector<8xf32>
    %4 = vector.multi_reduction <add>, %1, %cst [1] : vector<8x32xf32> to vector<8xf32>
    %5 = vector.shape_cast %4 : vector<8xf32> to vector<8x1xf32>
    %cst_6 = arith.constant 3.200000e+01 : f32
    %6 = vector.broadcast %cst_6 : f32 to vector<8x1xf32>
    %7 = arith.divf %5, %6 : vector<8x1xf32>
    %8 = vector.broadcast %7 : vector<8x1xf32> to vector<8x32xf32>
    %9 = arith.subf %1, %8 : vector<8x32xf32>
    %10 = arith.mulf %9, %9 : vector<8x32xf32>
    %cst_7 = arith.constant dense<0.000000e+00> : vector<8xf32>
    %11 = vector.multi_reduction <add>, %10, %cst_7 [1] : vector<8x32xf32> to vector<8xf32>
    %12 = vector.shape_cast %11 : vector<8xf32> to vector<8x1xf32>
    %cst_8 = arith.constant 3.200000e+01 : f32
    %13 = vector.broadcast %cst_8 : f32 to vector<8x1xf32>
    %14 = arith.divf %12, %13 : vector<8x1xf32>
    %15 = vector.broadcast %7 : vector<8x1xf32> to vector<8x32xf32>
    %16 = arith.subf %1, %15 : vector<8x32xf32>
    %cst_9 = arith.constant 9.99999974E-6 : f32
    %17 = vector.broadcast %cst_9 : f32 to vector<8x1xf32>
    %18 = arith.addf %14, %17 : vector<8x1xf32>
    %19 = math.rsqrt %18 : vector<8x1xf32>
    %20 = vector.broadcast %19 : vector<8x1xf32> to vector<8x32xf32>
    %21 = arith.mulf %16, %20 : vector<8x32xf32>
    %22 = vector.broadcast %2 : vector<1x32xf32> to vector<8x32xf32>
    %23 = arith.mulf %21, %22 : vector<8x32xf32>
    %24 = vector.broadcast %3 : vector<1x32xf32> to vector<8x32xf32>
    %25 = arith.addf %23, %24 : vector<8x32xf32>
    %26 = arith.truncf %25 : vector<8x32xf32> to vector<8x32xbf16>
    %c0_10 = arith.constant 0 : index
    %c0_11 = arith.constant 0 : index
    %27 = vector.load %arg5[%c0_10, %c0_11] : memref<32x96xbf16, #tpu.memory_space<vmem>>, vector<32x96xbf16>
    %cst_12 = arith.constant dense<0.000000e+00> : vector<8x96xf32>
    %28 = tpu.matmul %26, %27, %cst_12 {dimension_numbers = #tpu.dot_dimension_numbers<[1], [0], [0], [1], [0, 0, 1, 1], [], []>} : vector<8x32xbf16>, vector<32x96xbf16>, vector<8x96xf32> -> vector<8x96xf32>
    %29 = vector.extract_strided_slice %28 {offsets = [0, 0], sizes = [8, 32], strides = [1, 1]} : vector<8x96xf32> to vector<8x32xf32>
    %cst_13 = arith.constant 0.353553385 : f32
    %30 = vector.broadcast %cst_13 : f32 to vector<8x32xf32>
    %31 = arith.mulf %29, %30 : vector<8x32xf32>
    %32 = arith.truncf %31 : vector<8x32xf32> to vector<8x32xbf16>
    %c0_14 = arith.constant 0 : index
    %c0_15 = arith.constant 0 : index
    %c0_16 = arith.constant 0 : index
    %33 = vector.load %arg6[%c0_14, %c0_15, %c0_16] : memref<1x8x32xbf16, #tpu.memory_space<vmem>>, vector<1x8x32xbf16>
    %34 = vector.shape_cast %33 : vector<1x8x32xbf16> to vector<8x32xbf16>
    %35 = vector.shape_cast %32 : vector<8x32xbf16> to vector<1x8x32xbf16>
    tpu.vector_store %arg6[%c0_14, %c0_15, %c0_16], %35 {strides = array<i32>} : memref<1x8x32xbf16, #tpu.memory_space<vmem>>, vector<1x8x32xbf16>,
    %36 = vector.extract_strided_slice %28 {offsets = [0, 32], sizes = [8, 32], strides = [1, 1]} : vector<8x96xf32> to vector<8x32xf32>
    %37 = arith.truncf %36 : vector<8x32xf32> to vector<8x32xbf16>
    %c0_17 = arith.constant 0 : index
    %c0_18 = arith.constant 0 : index
    %c0_19 = arith.constant 0 : index
    %38 = vector.load %arg7[%c0_17, %c0_18, %c0_19] : memref<1x8x32xbf16, #tpu.memory_space<vmem>>, vector<1x8x32xbf16>
    %39 = vector.shape_cast %38 : vector<1x8x32xbf16> to vector<8x32xbf16>
    %40 = vector.shape_cast %37 : vector<8x32xbf16> to vector<1x8x32xbf16>
    tpu.vector_store %arg7[%c0_17, %c0_18, %c0_19], %40 {strides = array<i32>} : memref<1x8x32xbf16, #tpu.memory_space<vmem>>, vector<1x8x32xbf16>,
    %41 = vector.extract_strided_slice %28 {offsets = [0, 64], sizes = [8, 32], strides = [1, 1]} : vector<8x96xf32> to vector<8x32xf32>
    %42 = arith.truncf %41 : vector<8x32xf32> to vector<8x32xbf16>
    %c0_20 = arith.constant 0 : index
    %c0_21 = arith.constant 0 : index
    %c0_22 = arith.constant 0 : index
    %43 = vector.load %arg8[%c0_20, %c0_21, %c0_22] : memref<1x8x32xbf16, #tpu.memory_space<vmem>>, vector<1x8x32xbf16>
    %44 = vector.shape_cast %43 : vector<1x8x32xbf16> to vector<8x32xbf16>
    %45 = vector.shape_cast %42 : vector<8x32xbf16> to vector<1x8x32xbf16>
    tpu.vector_store %arg8[%c0_20, %c0_21, %c0_22], %45 {strides = array<i32>} : memref<1x8x32xbf16, #tpu.memory_space<vmem>>, vector<1x8x32xbf16>,
    return
  }
  func.func @transform_0(%arg0: i32, %arg1: i32) -> (i32, i32, i32) {
    %c0_i32 = arith.constant 0 : i32
    %c0_i32_0 = arith.constant 0 : i32
    return %arg1, %arg0, %c0_i32 : i32, i32, i32
  }
  func.func @transform_1(%arg0: i32, %arg1: i32) -> (i32, i32) {
    %c0_i32 = arith.constant 0 : i32
    %c0_i32_0 = arith.constant 0 : i32
    %c0_i32_1 = arith.constant 0 : i32
    return %c0_i32, %c0_i32_0 : i32, i32
  }
  func.func @transform_2(%arg0: i32, %arg1: i32) -> (i32, i32) {
    %c0_i32 = arith.constant 0 : i32
    %c0_i32_0 = arith.constant 0 : i32
    %c0_i32_1 = arith.constant 0 : i32
    return %c0_i32, %c0_i32_0 : i32, i32
  }
  func.func @transform_3(%arg0: i32, %arg1: i32) -> (i32, i32) {
    %c0_i32 = arith.constant 0 : i32
    %c0_i32_0 = arith.constant 0 : i32
    %c0_i32_1 = arith.constant 0 : i32
    return %c0_i32, %c0_i32_0 : i32, i32
  }
  func.func @transform_4(%arg0: i32, %arg1: i32) -> (i32, i32, i32) {
    %c0_i32 = arith.constant 0 : i32
    %c0_i32_0 = arith.constant 0 : i32
    return %arg1, %arg0, %c0_i32 : i32, i32, i32
  }
  func.func @transform_5(%arg0: i32, %arg1: i32) -> (i32, i32, i32) {
    %c0_i32 = arith.constant 0 : i32
    %c0_i32_0 = arith.constant 0 : i32
    return %arg1, %arg0, %c0_i32 : i32, i32, i32
  }
  func.func @transform_6(%arg0: i32, %arg1: i32) -> (i32, i32, i32) {
    %c0_i32 = arith.constant 0 : i32
    %c0_i32_0 = arith.constant 0 : i32
    return %arg1, %arg0, %c0_i32 : i32, i32, i32
  }
}

</mosaic_0001>

<bundles_post_ra>
// kernel: tpu_custom_call.1
= control target key start
LH: loop header
LB: loop body
LE: loop exit
PB: predicated region body
PF: predicated region fallthrough
CT: control target
= control target key end

     0   :  { %s1325_s0 = inlined_call_operand.hbm [shape: f32[2,8,32], index: 0, kind: input, shape index: {}]   ;;  %s1326_s1 = inlined_call_operand.vmem [shape: f32[1,32], index: 1, kind: input, shape index: {}]   ;;  %s1327_s2 = inlined_call_operand.vmem [shape: f32[1,32], index: 2, kind: input, shape index: {}]   ;;  %s1328_s3 = inlined_call_operand.hbm [shape: bf16[32,96], index: 3, kind: input, shape index: {}]   ;;  %s1329_s4 = inlined_call_operand.hbm [shape: bf16[2,8,32], index: 4, kind: output, shape index: {0}]   ;;  %s1330_s5 = inlined_call_operand.hbm [shape: bf16[2,8,32], index: 5, kind: output, shape index: {1}]   ;;  %s1331_s6 = inlined_call_operand.hbm [shape: bf16[2,8,32], index: 6, kind: output, shape index: {2}]  }
   0x1   :  { %1336 = sst [smem:[#allocation15_spill]] %s1328_s3 }
   0x2   :  { %12 = vsyncpa [#allocation3], 0 }
   0x3   :  { %14 = vsyncpa [#allocation3 + $0x1], 0 }
   0x4   :  { %15 = vsyncpa [#allocation6], 0 }
   0x5   :  { %16 = vsyncpa [#allocation4], 0 }
   0x6   :  { %18 = vsyncpa [#allocation4 + $0x1], 0 }
   0x7   :  { %19 = vsyncpa [#allocation9], 0 }
   0x8   :  { %21 = vsyncpa [#allocation9 + $0x1], 0  ;;  %s1020_s21 = smov 0   ;;  %s1022_s22 = smov 0  }
   0x9   :  { %s1024_s23 = smov 0   ;;  %s1026_s24 = smov 0  }
   0xa   :  { %s1028_s25 = smov 0   ;;  %s1030_s26 = smov 0  }
   0xb LB: > { %s1051_s27 = sadd.s32 4294967295, %s972_s26   ;;  %s1335_s28 = sadd.s32 4294967294, %s972_s26   ;;  %s972_s26 = sphi %s1030_s26, %s27_s26   ;;  %s968_s25 = sphi %s1028_s25, %s1357_s25   ;;  %s964_s24 = sphi %s1026_s24, %s1356_s24   ;;  %s960_s23 = sphi %s1024_s23, %s1355_s23   ;;  %s956_s22 = sphi %s1022_s22, %s1354_s22   ;;  %s952_s21 = sphi %s1020_s21, %s1353_s21  }
   0xc   : > { %p61_p0 = scmp.ne.s32.totalorder %s956_s22, %s952_s21  ;;  %p1332_p1 = scmp.eq.s32.totalorder %s1051_s27, 0 }
   0xd   : > { %p156_p3 = scmp.eq.s32.totalorder %s1335_s28, 1  ;;  %p638_p5 = scmp.ge.s32.totalorder %s972_s26, 1 }
   0xe   : > { %p1062_p4 = por %p1332_p1, %p61_p0  ;;  %p219_p7 = scmp.lt.s32.totalorder %s972_s26, 3 }
   0xf   : > { %p1067_p6 = por %p156_p3, %p61_p0  ;;  %s974_s8 = smov [#allocation5]  }
  0x10   : > { %s1337_s29 = scalar_select %p1062_p4, 1, 0 }
  0x11   : > { %s1338_s30 = scalar_select %p1067_p6, 1, 0 }
  0x12   : > { %p1072_p8 = pnand %p638_p5, %p219_p7  ;;  %s237_s9 = sshll.u32 %s974_s8, 4  ;;  %s238_s9 = int_to_ptr.vmem [resolvable:$true] %s237_s9 }
  0x13   : > { %s36_s11 = sadd.s32 1, %s968_s25  ;;  %s1341_s3 = sld [smem:[#allocation15_spill]] }
  0x14   : > { %s1339_s7 = scalar_select %p1072_p8, 1, 0 }
  0x15   : > { %p687_p9 = pneg %p1072_p8 }
  0x17   : > { %p1081_p11 = pnand %p687_p9, %p1332_p1 }
  0x19   : > { %s768_s14 = scalar_lea.hbm %s1341_s3, 256  ;;  %p770_p13 = pneg %p1081_p11 }
  0x1a   : > { %p769_p12 = scmp.ne.s32.totalorder %s1341_s3, %s768_s14  ;;  %p775_p5 = scmp.lt.u32.totalorder %s768_s14, %s1341_s3 }
  0x1c   : > { %p771_p0 = pnand %p770_p13, %p769_p12 }
  0x1e   : > { %p772_p3 = pneg %p771_p0 }
  0x20   : > { %p777_p7 = pnand %p775_p5, %p772_p3 }
  0x22   : > { %780 = shalt.err (!%p777_p7)
}
  0x23   : > { %s781_s19 = scalar_lea.vmem %s238_s9, 256  ;;  %p789_p2 = scmp.lt.s32.totalorder %s238_s9, %s238_s9 }
  0x24   : > { %p782_p9 = scmp.ne.s32.totalorder %s238_s9, %s781_s19  ;;  %p790_p6 = scmp.lt.s32.totalorder %s781_s19, %s781_s19 }
  0x26   : > { %p784_p10 = pnand %p782_p9, %p770_p13  ;;  %p791_p4 = por %p790_p6, %p789_p2 }
  0x28   : > { %p785_p1 = pneg %p784_p10 }
  0x2a   : > { %p792_p8 = pnand %p791_p4, %p785_p1 }
  0x2c   : > { %795 = shalt.err (!%p792_p8)
}
  0x2d   : > { %s975_s20 = smov 64   ;;  %s976_s8 = smov 4  }
  0x2e   : > { %690 = dma.hbm_to_vmem [thread:$0]  (!%p1081_p11), %s1341_s3, 256, %s238_s9, [#allocation6], %s975_s20, %s975_s20, %s976_s8  }
  0x2f   : > { %p37_p1 = scmp.ge.s32.totalorder %s36_s11, 2  ;;  %s48_s14 = sadd.s32 1, %s960_s23 }
  0x30   : > { %p55_p2 = scmp.ne.s32.totalorder %s960_s23, %s956_s22  ;;  %p56_p4 = scmp.eq.s32.totalorder %s972_s26, 0 }
  0x31   : > { %s1359_s11 = smov (%p37_p1, %s36_s11), 0  ;;  %p1343_p8 = scmp.eq.s32.totalorder %s1051_s27, 1 }
  0x32   : > { %p1108_p6 = por %p56_p4, %p55_p2  ;;  %s43_s10 = ssub.s32 %s968_s25, %s1359_s11 }
  0x33   : > { %p1114_p10 = por %p1343_p8, %p55_p2  ;;  %p706_p12 = scmp.lt.s32.totalorder %s972_s26, 2 }
  0x34   : > { %p46_p11 = scmp.eq.s32.totalorder %s43_s10, 0  ;;  %s251_s9 = sand.u32 1, %s960_s23  }
  0x35   : > { %s641_s17 = sshll.u32 %s251_s9, 3  ;;  %s642_s19 = sshll.u32 %s968_s25, 7 }
  0x36   : > { %s1123_s18 = scalar_select %p46_p11, %s960_s23, %s48_s14  }
  0x37   : > { %s1129_s12 = scalar_lea.hbm %s1325_s0, %s642_s19  ;;  %s255_s13 = scalar_lea.vmem [#allocation2], %s641_s17 }
  0x38   : > { %s263_s28 = sshll.u32 %s255_s13, 4  ;;  %p1135_p13 = pnand %p706_p12, %p1108_p6  ;;  %s1131_s28 = int_to_ptr.vmem [resolvable:$true] %s263_s28 }
  0x39   : > { %s252_s14 = scalar_lea.sflag [#allocation3], %s251_s9  ;;  %s796_s3 = scalar_lea.hbm %s1129_s12, 128 }
  0x3a   : > { %p797_p0 = scmp.ne.s32.totalorder %s1129_s12, %s796_s3  ;;  %p798_p3 = pneg %p1135_p13 }
  0x3b   : > { %s801_s20 = scalar_lea.hbm %s1325_s0, 256  ;;  %p802_p9 = scmp.lt.u32.totalorder %s1129_s12, %s1325_s0 }
  0x3c   : > { %p799_p5 = pnand %p798_p3, %p797_p0  ;;  %p803_p1 = scmp.lt.u32.totalorder %s801_s20, %s796_s3 }
  0x3d   : > { %p805_p4 = scmp.lt.u32.totalorder %s796_s3, %s1129_s12 }
  0x3e   : > { %p800_p7 = pneg %p799_p5  ;;  %p804_p2 = por %p803_p1, %p802_p9 }
  0x40   : > { %p806_p6 = por %p805_p4, %p804_p2 }
  0x42   : > { %p807_p8 = pnand %p806_p6, %p800_p7 }
  0x44   : > { %810 = shalt.err (!%p807_p8)
}
  0x45   : > { %s811_s9 = scalar_lea.vmem %s1131_s28, 128  ;;  %s977_s13 = smov [#allocation2]  }
  0x46   : > { %p812_p12 = scmp.ne.s32.totalorder %s1131_s28, %s811_s9  ;;  %s816_s17 = sshll.u32 %s977_s13, 4  ;;  %s817_s17 = int_to_ptr.vmem [resolvable:$false] %s816_s17 }
  0x47   : > { %s818_s19 = scalar_lea.vmem %s817_s17, 256  ;;  %p819_p5 = scmp.lt.s32.totalorder %s1131_s28, %s817_s17 }
  0x48   : > { %p814_p11 = pnand %p812_p12, %p798_p3  ;;  %p820_p9 = scmp.lt.s32.totalorder %s818_s19, %s811_s9 }
  0x4a   : > { %p815_p0 = pneg %p814_p11  ;;  %p821_p1 = por %p820_p9, %p819_p5 }
  0x4c   : > { %p822_p2 = pnand %p821_p1, %p815_p0 }
  0x4e   : > { %825 = shalt.err (!%p822_p2)
}
  0x4f   : > { %694 = dma.hbm_to_vmem [thread:$0]  (!%p1135_p13), %s1129_s12, 128, %s1131_s28, %s252_s14  }
  0x50   : > { %p1346_p7 = scmp.ne.s32.totalorder %s1339_s7, 0 }
  0x51   : > { %s1167_s3 = sand.u32 (!%p1346_p7), 1, %s956_s22   ;;  %p1347_p3 = scmp.ne.s32.totalorder (!%p1346_p7), %s1337_s29, 0 }
  0x52   : > { %272 = sbr.rel (%p1346_p7) target bundleno = 775 (0x307), region = 36  ;;  %s644_s20 = sshll.u32 (!%p1346_p7), %s1167_s3, 3 }
  0x53   : > { %s275_s15 = scalar_lea.sflag (!%p1346_p7), [#allocation3], %s1167_s3  ;;  %s278_s8 = scalar_lea.vmem (!%p1346_p7), [#allocation2], %s644_s20 }
  0x59   : > { %935 = dma.done.wait (%p1347_p3), %s275_s15, 128  }
  0x5a   : > { %937 = vsyncadd (%p1347_p3), %s275_s15, 4294967168  ;;  %p1348_p4 = scmp.eq.s32.totalorder %s1051_s27, 0 }
  0x5c   : > { %939 = dma.done.wait (%p1348_p4), [#allocation6], 256   ;;  %p1349_p13 = pmov %p1348_p4 }
  0x5d   : > { %vm325_vm0 = vcmask 261120   ;;  %v322_v0 = vld [vmem:[%s278_s8] sm:$0xff]  ;;  %v764_v7 = vld [vmem:[#allocation5] sm:$0xff]   ;;  %v978_v8 = vmov 0.0   ;;  %v765_v9 = vld [vmem:[#allocation5 + $0x8] sm:$0xff]   ;;  %vm979_vm1 = vmmov 0  }
  0x5e   : > { %941 = vsyncadd (%p1349_p13), [#allocation6], 4294967040  ;;  %v326_v1 = vsel %vm325_vm0, %v322_v0, 0.0  ;;  %667 = vmatprep.subr.bf16.mxu0 %v978_v8  ;;  %671 = vmatprep.mubr.msk.bf16.mxu0 %vm979_vm1, %v978_v8  ;;  %v649_v14 = vld [vmem:[%s1326_s1] ss:$0 sm:$0xff]  ;;  %s1189_s10 = sshll.u32 %s1167_s3, 2 }
  0x5f   : > { %327 = vadd.xlane.f32.xlu0 %v326_v1  ;;  %668 = vmatpush3.bf16.msra.mxu0 %v764_v7  ;;  %v650_v16 = vld [vmem:[%s1327_s2] ss:$0 sm:$0xff]  ;;  %s1192_s14 = sshll.u32 %s964_s24, 6  ;;  %s306_s9 = scalar_lea.vmem [#allocation7], %s1189_s10  ;;  %vm416_vm2 = vcmask 257024  }
  0x60   : > { %669 = vmatprep.subr.bf16.mxu0 %v978_v8  ;;  %s455_s13 = sshll.u32 %s306_s9, 4  ;;  %s980_s17 = smov 96   ;;  %s1201_s13 = int_to_ptr.vmem [resolvable:$true] %s455_s13 }
  0x61   : > { %s1199_s15 = scalar_lea.hbm %s1329_s4, %s1192_s14  ;;  %s431_s24 = scalar_lea.sflag [#allocation4], %s1167_s3 }
  0x62   : > { %s826_s8 = scalar_lea.vmem %s1201_s13, 64  ;;  %s981_s28 = smov [#allocation7]  }
  0x63   : > { %670 = vmatpush3.bf16.msra.mxu0 %v765_v9  ;;  %p827_p6 = scmp.ne.s32.totalorder %s1201_s13, %s826_s8  ;;  %s830_s29 = sshll.u32 %s981_s28, 4  ;;  %s831_s29 = int_to_ptr.vmem [resolvable:$false] %s830_s29 }
  0x64   : > { %s832_s7 = scalar_lea.vmem %s831_s29, 128  ;;  %p833_p11 = scmp.lt.s32.totalorder %s1201_s13, %s831_s29 }
  0x65   : > { %p828_p8 = pnand %p827_p6, %p1114_p10  ;;  %p834_p0 = scmp.lt.s32.totalorder %s832_s7, %s826_s8 }
  0x67   : > { %p829_p12 = pneg %p828_p8  ;;  %p835_p5 = por %p834_p0, %p833_p11 }
  0x69   : > { %p836_p9 = pnand %p835_p5, %p829_p12 }
  0xec   : > { %v328_v2 = vpop.xlane.xlu0 %327 }
  0xed   : > { %v330_v3 = vmul.f32 0.03125, %v328_v2 }
  0xef   : > { %v331_v4 = vsub.f32 %v322_v0, %v330_v3 }
  0xf1   : > { %v332_v5 = vmul.f32 %v331_v4, %v331_v4 }
  0xf3   : > { %v333_v6 = vsel %vm325_vm0, %v332_v5, 0.0 }
  0xf4   : > { %334 = vadd.xlane.f32.xlu0 %v333_v6 }
 0x181   : > { %v335_v10 = vpop.xlane.xlu0 %334 }
 0x182   : > { %v336_v11 = vmul.f32 0.03125, %v335_v10 }
 0x184   : > { %v337_v12 = vadd.f32 1e-05, %v336_v11 }
 0x186   : > { %766 = vrsqrt.f32 %v337_v12 }
 0x190   : > { %v767_v13 = vpop.eup %766 }
 0x191   : > { %v339_v15 = vmul.f32 %v767_v13, %v331_v4 }
 0x193   : > { %v346_v17 = vmul.f32 %v649_v14, %v339_v15 }
 0x195   : > { %v353_v18 = vadd.f32 %v650_v16, %v346_v17 }
 0x197   : > { %v354_v19 = vpack.c.bf16 %v353_v18, %v353_v18 }
 0x199   : > { %672 = vmatmul.mubr.msk.bf16.vlgmr.msra.gmra.mrb[0].mxu0 %vm325_vm0, %v354_v19 }
 0x26c   : > { %v408_v20 = vpop.f32.mrb[0].mxu0 }
 0x26d   : > { %v414_v21 = vmul.f32 0.35355338, %v408_v20  ;;  %v673_v22 = vpop.f32.mrb[1].mxu0  ;;  %v663_v23 = vpack.c.bf16 %v408_v20, %v408_v20 }
 0x26e   : > { %v411_v24 = vpop.f32.mrb[2].mxu0 }
 0x26f   : > { %v415_v25 = vpack.c.bf16 %v414_v21, %v414_v21  ;;  %422 = vrot.lane.b32.xlu1 %v663_v23, %s980_s17  ;;  %v674_v26 = vpop.f32.mrb[3].mxu0 }
 0x271   : > { %417 = vst.msk [vmem:[%s306_s9] sm:$0xf] %vm416_vm2, %v415_v25 }
 0x272   : > { %839 = shalt.err (!%p836_p9)
}
 0x273   : > { %s840_s3 = scalar_lea.hbm %s1199_s15, 64  ;;  %s844_s17 = scalar_lea.hbm %s1329_s4, 128 }
 0x274   : > { %p841_p1 = scmp.ne.s32.totalorder %s1199_s15, %s840_s3  ;;  %p845_p3 = scmp.lt.u32.totalorder %s1199_s15, %s1329_s4 }
 0x275   : > { %p846_p4 = scmp.lt.u32.totalorder %s844_s17, %s840_s3  ;;  %p848_p6 = scmp.lt.u32.totalorder %s840_s3, %s1199_s15 }
 0x276   : > { %p842_p2 = pnand %p841_p1, %p1114_p10 }
 0x277   : > { %p847_p13 = por %p846_p4, %p845_p3 }
 0x278   : > { %p843_p7 = pneg %p842_p2 }
 0x279   : > { %p849_p8 = por %p848_p6, %p847_p13 }
 0x27b   : > { %p850_p12 = pnand %p849_p8, %p843_p7 }
 0x27d   : > { %853 = shalt.err (!%p850_p12)
}
 0x27e   : > { %681 = dma.vmem_to_hbm [thread:$0]  (%p1114_p10), %s1201_s13, 64, %s1199_s15, %s431_s24  }
 0x27f   : > { %s982_s8 = smov 64   ;;  %s435_s28 = sand.u32 1, %s1051_s27  }
 0x280   : > { %426 = vrot.lane.b32.xlu1 %v663_v23, %s982_s8  ;;  %s313_s29 = scalar_lea.vmem [#allocation8], %s1189_s10  ;;  %s1232_s9 = scalar_lea.hbm %s1330_s5, %s1192_s14 }
 0x281   : > { %s469_s7 = sshll.u32 %s313_s29, 4  ;;  %s320_s17 = scalar_lea.vmem [#allocation10], %s1189_s10  ;;  %s1234_s7 = int_to_ptr.vmem [resolvable:$true] %s469_s7 }
 0x282   : > { %s1239_s19 = sshll.u32 %s320_s17, 4  ;;  %s1242_s27 = scalar_lea.sflag [#allocation9], %s435_s28  ;;  %s1273_s19 = int_to_ptr.vmem [resolvable:$true] %s1239_s19 }
 0x283   : > { %s854_s13 = scalar_lea.vmem %s1234_s7, 64  ;;  %s983_s15 = smov [#allocation8]  }
 0x284   : > { %p855_p11 = scmp.ne.s32.totalorder %s1234_s7, %s854_s13  ;;  %s858_s24 = sshll.u32 %s983_s15, 4  ;;  %s859_s24 = int_to_ptr.vmem [resolvable:$false] %s858_s24 }
 0x285   : > { %s860_s20 = scalar_lea.vmem %s859_s24, 128  ;;  %p861_p9 = scmp.lt.s32.totalorder %s1234_s7, %s859_s24 }
 0x286   : > { %p856_p0 = pnand %p855_p11, %p1114_p10  ;;  %p862_p1 = scmp.lt.s32.totalorder %s860_s20, %s854_s13 }
 0x288   : > { %p857_p5 = pneg %p856_p0  ;;  %p863_p2 = por %p862_p1, %p861_p9 }
 0x28a   : > { %p864_p7 = pnand %p863_p2, %p857_p5 }
 0x2e1   : > { %v423_v27 = vpop.permute.xlu1 %422 }
 0x2e2   : > { %425 = vst.msk [vmem:[%s313_s29] sm:$0xf] %vm416_vm2, %v423_v27 }
 0x2e3   : > { %867 = shalt.err (!%p864_p7)
}
 0x2e4   : > { %s868_s8 = scalar_lea.hbm %s1232_s9, 64  ;;  %s872_s3 = scalar_lea.hbm %s1330_s5, 128 }
 0x2e5   : > { %p869_p3 = scmp.ne.s32.totalorder %s1232_s9, %s868_s8  ;;  %p873_p6 = scmp.lt.u32.totalorder %s1232_s9, %s1330_s5 }
 0x2e6   : > { %p874_p8 = scmp.lt.u32.totalorder %s872_s3, %s868_s8  ;;  %p876_p11 = scmp.lt.u32.totalorder %s868_s8, %s1232_s9 }
 0x2e7   : > { %p870_p4 = pnand %p869_p3, %p1114_p10 }
 0x2e8   : > { %p875_p12 = por %p874_p8, %p873_p6 }
 0x2e9   : > { %p871_p13 = pneg %p870_p4 }
 0x2ea   : > { %p877_p0 = por %p876_p11, %p875_p12 }
 0x2ec   : > { %p878_p5 = pnand %p877_p0, %p871_p13 }
 0x2ee   : > { %881 = shalt.err (!%p878_p5)
}
 0x2ef   : > { %682 = dma.vmem_to_hbm [thread:$0]  (%p1114_p10), %s1234_s7, 64, %s1232_s9, %s1242_s27  }
 0x2f0   : > { %s1270_s20 = scalar_lea.hbm %s1331_s6, %s1192_s14  ;;  %s882_s8 = scalar_lea.vmem %s1273_s19, 64 }
 0x2f1   : > { %p883_p9 = scmp.ne.s32.totalorder %s1273_s19, %s882_s8  ;;  %s984_s7 = smov [#allocation10]  }
 0x2f2   : > { %v427_v28 = vpop.permute.xlu1 %426  ;;  %s886_s9 = sshll.u32 %s984_s7, 4  ;;  %s887_s9 = int_to_ptr.vmem [resolvable:$false] %s886_s9 }
 0x2f3   : > { %429 = vst.msk [vmem:[%s320_s17] sm:$0xf] %vm416_vm2, %v427_v28  ;;  %p884_p1 = pnand %p883_p9, %p1114_p10  ;;  %s888_s28 = scalar_lea.vmem %s887_s9, 128 }
 0x2f4   : > { %p889_p7 = scmp.lt.s32.totalorder %s1273_s19, %s887_s9  ;;  %p890_p3 = scmp.lt.s32.totalorder %s888_s28, %s882_s8 }
 0x2f5   : > { %p885_p2 = pneg %p884_p1 }
 0x2f6   : > { %p891_p4 = por %p890_p3, %p889_p7 }
 0x2f8   : > { %p892_p13 = pnand %p891_p4, %p885_p2 }
 0x2fa   : > { %895 = shalt.err (!%p892_p13)
}
 0x2fb   : > { %s896_s10 = scalar_lea.hbm %s1270_s20, 64  ;;  %s900_s29 = scalar_lea.hbm %s1331_s6, 128 }
 0x2fc   : > { %p897_p6 = scmp.ne.s32.totalorder %s1270_s20, %s896_s10  ;;  %p901_p11 = scmp.lt.u32.totalorder %s1270_s20, %s1331_s6 }
 0x2fd   : > { %p902_p0 = scmp.lt.u32.totalorder %s900_s29, %s896_s10  ;;  %p904_p9 = scmp.lt.u32.totalorder %s896_s10, %s1270_s20 }
 0x2fe   : > { %p898_p8 = pnand %p897_p6, %p1114_p10 }
 0x2ff   : > { %p903_p5 = por %p902_p0, %p901_p11 }
 0x300   : > { %p899_p12 = pneg %p898_p8 }
 0x301   : > { %p905_p1 = por %p904_p9, %p903_p5 }
 0x303   : > { %p906_p2 = pnand %p905_p1, %p899_p12 }
 0x305   : > { %909 = shalt.err (!%p906_p2)
}
 0x306   : > { %683 = dma.vmem_to_hbm [thread:$0]  (%p1114_p10), %s1273_s19, 64, %s1270_s20, %s1242_s27  }
 0x307 PF: > { %s495_s15 = sand.u32 1, %s952_s21   ;;  %p1350_p7 = scmp.ne.s32.totalorder %s1338_s30, 0 }
 0x308   : > { %p1351_p3 = scmp.ge.s32.totalorder %s972_s26, 2  ;;  %s496_s13 = scalar_lea.sflag [#allocation4], %s495_s15 }
 0x30a   : > { %p696_p4 = pnand %p1351_p3, %p1350_p7 }
 0x30c   : > { %943 = dma.done.wait (!%p696_p4), %s496_s13, 64  }
 0x30d   : > { %945 = vsyncadd (!%p696_p4), %s496_s13, 4294967232  ;;  %s1352_s24 = sadd.s32 4294967294, %s972_s26  }
 0x30e   : > { %s504_s8 = sand.u32 1, %s1352_s24  }
 0x30f   : > { %s505_s7 = scalar_lea.sflag [#allocation9], %s504_s8 }
 0x310   : > { %947 = dma.done.wait (!%p696_p4), %s505_s7, 128  }
 0x311   : > { %949 = vsyncadd (!%p696_p4), %s505_s7, 4294967168  ;;  %s27_s26 = sadd.s32 1, %s972_s26   ;;  %s1353_s21 = smov %s956_s22 }
 0x312   : > { %p24_p10 = scmp.ge.s32.totalorder %s27_s26, 4   ;;  %s1354_s22 = smov %s960_s23 }
 0x313   : > { %s1355_s23 = smov %s1123_s18  ;;  %s1356_s24 = smov %s968_s25 }
 0x314   : > { %s1357_s25 = smov %s1359_s11  ;;  %26 = sbr.rel (!%p24_p10) target bundleno = 11 (0xb), region = 117 }
 0x31b   :  { %519 = vsyncpa [#allocation3], 1 }
 0x31c   :  { %521 = vsyncpa [#allocation3 + $0x1], 1 }
 0x31d   :  { %522 = vsyncpa [#allocation6], 1 }
 0x31e   :  { %523 = vsyncpa [#allocation4], 1 }
 0x31f   :  { %525 = vsyncpa [#allocation4 + $0x1], 1 }
 0x320   :  { %526 = vsyncpa [#allocation9], 1 }
 0x321   :  { %528 = vsyncpa [#allocation9 + $0x1], 1 }

</bundles_post_ra>
